<compile_context>
chip_gen: v7x
topology: tpu7x:2x2x1
jax: 0.10.0
libtpu: 0.0.40
codegen_flags: <defaults>
</compile_context>

<pallas_src>
import functools
import math

import jax
import jax.numpy as jnp
from jax.experimental import pallas as pl
from jax.experimental.pallas import tpu as pltpu

_LANE = 128


def make_positional_encoding(d_model: int, max_len: int = 5000) -> jnp.ndarray:
    """Deterministic sin/cos table matching the PyTorch __init__ exactly.

    Returns pe of shape (max_len, d_model); the singleton batch axis of the
    PyTorch buffer (max_len, 1, d_model) is added in the wrapper when needed.
    """
    position = jnp.arange(0, max_len, dtype=jnp.float32)[:, None]           # (L, 1)
    div_term = jnp.exp(
        jnp.arange(0, d_model, 2, dtype=jnp.float32) * (-math.log(10000.0) / d_model)
    )                                                                        # (D/2,)
    angles = position * div_term                                             # (L, D/2)
    pe = jnp.zeros((max_len, d_model), dtype=jnp.float32)
    pe = pe.at[:, 0::2].set(jnp.sin(angles))
    pe = pe.at[:, 1::2].set(jnp.cos(angles))
    return pe


# ----------------------------- kernels --------------------------------------


def _add_pe_kernel_3d(x_ref, pe_ref, o_ref):
    # x_ref: (tS, tB, D) tile; pe_ref: (tS, 1, D) tile broadcasting over the
    # batch (sublane) axis. Pure dense VPU add, no in-kernel casts.
    o_ref[...] = x_ref[...] + pe_ref[...]


def _add_pe_kernel_folded(x_ref, pe_ref, o_ref, *, batch: int):
    # x_ref: (tS, B*D) tile; pe_ref: (tS, D) tile. Replicate pe across the
    # batch groups folded into the lane axis (lane-concat; XLU/VPU slack is
    # free in this memory-bound kernel).
    pe = pe_ref[...]
    if batch > 1:
        pe = jnp.concatenate([pe] * batch, axis=-1)
    o_ref[...] = x_ref[...] + pe


# --------------------------- tiling helpers ----------------------------------


def _round_up(a: int, b: int) -> int:
    return -(-a // b) * b


def _round_down(a: int, b: int) -> int:
    return (a // b) * b


def _sublane(itemsize: int) -> int:
    return {4: 8, 2: 16, 1: 32}.get(itemsize, 8)


def _vmem_capacity_bytes() -> int:
    """Physical VMEM per TensorCore; conservative fallback = 64 MiB (v7x)."""
    try:
        cap = int(getattr(pltpu.get_tpu_info(), "vmem_capacity_bytes"))
        if cap > 0:
            return cap
    except Exception:
        pass
    return 64 * 1024 * 1024


# ------------------------------ wrapper ---------------------------------------


def positional_encoding_forward(x: jnp.ndarray, pe: jnp.ndarray) -> jnp.ndarray:
    """x: (S, B, D) float array; pe: (max_len, D). Returns x + pe[:S, None, :]."""
    S, B, D = x.shape
    itemsize = jnp.dtype(x.dtype).itemsize
    sublane = _sublane(itemsize)

    # Wrapper-side prep (cheap glue): slice to S rows, cast to x.dtype once.
    pe_s = pe[:S].astype(x.dtype)                                            # (S, D)

    capacity = _vmem_capacity_bytes()
    target = capacity // 4            # total double-buffered footprint target
    vmem_cap = (capacity * 3) // 4    # never ask Mosaic for more than this

    cost = pl.CostEstimate(
        flops=S * B * D,
        transcendentals=0,
        bytes_accessed=(2 * S * B * D + S * D) * itemsize,
    )

    lane_row = _round_up(D, _LANE) * itemsize   # one padded (sublane-row x D) slab

    if B < sublane:
        # ---------- folded (small-batch) path: kernel sees (S, B*D) ----------
        row_x = _round_up(B * D, _LANE) * itemsize          # per seq row, lane-padded
        row_pe = lane_row
        per_row = 2 * (2 * row_x + row_pe)                  # 2x-buffered x, out, pe
        tS = max(1, min(S, target // per_row))
        if tS >= sublane:
            tS = _round_down(tS, sublane)                   # keep (8,128)-aligned blocks
        footprint = per_row * max(tS, sublane)
        vmem_limit = int(min(vmem_cap, max(32 * 1024 * 1024, footprint + (4 << 20))))

        x2d = x.reshape(S, B * D)                           # contiguous over (B,D): free
        out2d = pl.pallas_call(
            functools.partial(_add_pe_kernel_folded, batch=B),
            out_shape=jax.ShapeDtypeStruct((S, B * D), x.dtype),
            grid=(pl.cdiv(S, tS),),
            in_specs=[
                pl.BlockSpec((tS, B * D), lambda i: (i, 0)),
                pl.BlockSpec((tS, D), lambda i: (i, 0)),
            ],
            out_specs=pl.BlockSpec((tS, B * D), lambda i: (i, 0)),
            input_output_aliases={0: 0},
            cost_estimate=cost,
            compiler_params=pltpu.CompilerParams(
                dimension_semantics=("parallel",),
                vmem_limit_bytes=vmem_limit,
            ),
        )(x2d, pe_s)
        return out2d.reshape(S, B, D)

    # --------------- general path: kernel sees (S, B, D) tiles ---------------
    row_pe = sublane * lane_row                              # (tS,1,D) pads to (tS,sub,D)

    def row_x_bytes(tb: int) -> int:
        return _round_up(tb, sublane) * lane_row

    tB = B
    per_row = 2 * (2 * row_x_bytes(tB) + row_pe)
    if per_row > vmem_cap:
        # A single full-(B, D) seq row would blow the VMEM cap (huge B*D, e.g.
        # v5e with B=512, D=2048 f32): tile the batch axis too.
        budget_x = max((vmem_cap // 2 - row_pe) // 2, 1)
        tb_pad = budget_x // lane_row
        tB = int(min(B, max(sublane, _round_down(tb_pad, sublane))))
        per_row = 2 * (2 * row_x_bytes(tB) + row_pe)

    tS = max(1, min(S, target // per_row))
    if tS >= 8:
        tS = _round_down(tS, 8)
    footprint = per_row * tS
    vmem_limit = int(min(vmem_cap, max(32 * 1024 * 1024, footprint + (4 << 20))))

    pe_s3 = pe_s[:, None, :]                                 # (S, 1, D)
    return pl.pallas_call(
        _add_pe_kernel_3d,
        out_shape=jax.ShapeDtypeStruct((S, B, D), x.dtype),
        grid=(pl.cdiv(S, tS), pl.cdiv(B, tB)),
        in_specs=[
            pl.BlockSpec((tS, tB, D), lambda i, j: (i, j, 0)),
            pl.BlockSpec((tS, 1, D), lambda i, j: (i, 0, 0)),
        ],
        out_specs=pl.BlockSpec((tS, tB, D), lambda i, j: (i, j, 0)),
        input_output_aliases={0: 0},
        cost_estimate=cost,
        compiler_params=pltpu.CompilerParams(
            dimension_semantics=("parallel", "parallel"),
            vmem_limit_bytes=vmem_limit,
        ),
    )(x, pe_s3)


if __name__ == "__main__":
    d_model = 32
    max_len = 64          # small max_len for the synthetic test (module default 5000)
    seq_len = 8

    key = jax.random.PRNGKey(0)
    pe = make_positional_encoding(d_model, max_len)

    # --- small-batch (folded) path: batch=2 ---
    batch = 2
    x = jax.random.normal(key, (seq_len, batch, d_model), dtype=jnp.float32)
    ref = x + pe[:seq_len][:, None, :]          # reference computed before the kernel
    out = jax.block_until_ready(positional_encoding_forward(x, pe))
    assert out.shape == (seq_len, batch, d_model)
    assert jnp.allclose(out, ref, atol=1e-6, rtol=1e-6)

    # --- general (3-D) path: batch=8 ---
    batch2 = 8
    x2 = jax.random.normal(jax.random.PRNGKey(1), (seq_len, batch2, d_model),
                           dtype=jnp.float32)
    ref2 = x2 + pe[:seq_len][:, None, :]
    out2 = jax.block_until_ready(positional_encoding_forward(x2, pe))
    assert out2.shape == (seq_len, batch2, d_model)
    assert jnp.allclose(out2, ref2, atol=1e-6, rtol=1e-6)

    print("KERNEL_OK")
</pallas_src>

<mosaic_0001>
module attributes {stable_mosaic.version = 11 : i64} {
  func.func @_add_pe_kernel_folded(%arg0: i32, %arg1: memref<8x64xf32, #tpu.memory_space<vmem>>, %arg2: memref<8x32xf32, #tpu.memory_space<vmem>>, %arg3: memref<8x64xf32, #tpu.memory_space<vmem>>) attributes {dimension_semantics = [#tpu.dimension_semantics<parallel>], iteration_bounds = array<i64: 1>, scalar_prefetch = 0 : i64, scratch_operands = 0 : i64, tpu.core_type = #tpu.core_type<tc>, window_params = [{transform_indices = @transform_0, window_bounds = array<i64: 8, 64>}, {transform_indices = @transform_1, window_bounds = array<i64: 8, 32>}, {transform_indices = @transform_2, window_bounds = array<i64: 8, 64>}]} {
    %c0 = arith.constant 0 : index
    %c0_0 = arith.constant 0 : index
    %0 = vector.load %arg2[%c0, %c0_0] : memref<8x32xf32, #tpu.memory_space<vmem>>, vector<8x32xf32>
    %1 = tpu.concatenate %0, %0 in 1 : vector<8x32xf32>, vector<8x32xf32> -> vector<8x64xf32>
    %c0_1 = arith.constant 0 : index
    %c0_2 = arith.constant 0 : index
    %2 = vector.load %arg1[%c0_1, %c0_2] : memref<8x64xf32, #tpu.memory_space<vmem>>, vector<8x64xf32>
    %3 = arith.addf %2, %1 : vector<8x64xf32>
    %c0_3 = arith.constant 0 : index
    %c0_4 = arith.constant 0 : index
    %4 = vector.load %arg3[%c0_3, %c0_4] : memref<8x64xf32, #tpu.memory_space<vmem>>, vector<8x64xf32>
    tpu.vector_store %arg3[%c0_3, %c0_4], %3 {strides = array<i32>} : memref<8x64xf32, #tpu.memory_space<vmem>>, vector<8x64xf32>,
    return
  }
  func.func @transform_0(%arg0: i32) -> (i32, i32) {
    %c0_i32 = arith.constant 0 : i32
    %c0_i32_0 = arith.constant 0 : i32
    return %arg0, %c0_i32 : i32, i32
  }
  func.func @transform_1(%arg0: i32) -> (i32, i32) {
    %c0_i32 = arith.constant 0 : i32
    %c0_i32_0 = arith.constant 0 : i32
    return %arg0, %c0_i32 : i32, i32
  }
  func.func @transform_2(%arg0: i32) -> (i32, i32) {
    %c0_i32 = arith.constant 0 : i32
    %c0_i32_0 = arith.constant 0 : i32
    return %arg0, %c0_i32 : i32, i32
  }
}

</mosaic_0001>

<bundles_post_ra>
// kernel: tpu_custom_call.1
= control target key start
LH: loop header
LB: loop body
LE: loop exit
PB: predicated region body
PF: predicated region fallthrough
CT: control target
= control target key end

     0   :  { %7 = vsyncpa [#allocation3], 0  ;;  %s146_s0 = inlined_call_operand.hbm [shape: f32[8,64], index: 0, kind: input, shape index: {}, may-alias: {0,2}]   ;;  %s147_s1 = inlined_call_operand.vmem [shape: f32[8,32], index: 1, kind: input, shape index: {}]   ;;  %s148_s2 = inlined_call_operand.hbm [shape: f32[8,64], index: 2, kind: output, shape index: {}, may-alias: {0,2}]  }
   0x1   :  { %8 = vsyncpa [#allocation4], 0  ;;  %s101_s9 = smov [#allocation2]   ;;  %s53_s13 = scalar_lea.hbm %s146_s0, 128 }
   0x2   :  { %s15_s10 = sshll.u32 %s101_s9, 4  ;;  %p54_p0 = scmp.ne.s32.totalorder %s146_s0, %s53_s13  ;;  %s16_s10 = int_to_ptr.vmem [resolvable:$true] %s15_s10 }
   0x3   :  { %p57_p1 = scmp.lt.u32.totalorder %s53_s13, %s146_s0 }
   0x5   :  { %p59_p2 = pnand %p57_p1, %p54_p0 }
   0x7   :  { %62 = shalt.err (!%p59_p2)
}
   0x8   :  { %s63_s18 = scalar_lea.vmem %s16_s10, 128  ;;  %p68_p4 = scmp.lt.s32.totalorder %s16_s10, %s16_s10 }
   0x9   :  { %p64_p3 = scmp.ne.s32.totalorder %s16_s10, %s63_s18  ;;  %p69_p5 = scmp.lt.s32.totalorder %s63_s18, %s63_s18 }
   0xb   :  { %p70_p6 = por %p69_p5, %p68_p4 }
   0xd   :  { %p71_p7 = pnand %p70_p6, %p64_p3 }
   0xf   :  { %74 = shalt.err (!%p71_p7)
}
  0x10   :  { %18 = dma.hbm_to_vmem [thread:$0]  %s146_s0, 128, %s16_s10, [#allocation3]  }
  0x11   :  { %97 = dma.done.wait [#allocation3], 128  }
  0x12   :  { %98 = vsyncadd [#allocation3], 4294967168  ;;  %v24_v0 = vld [vmem:[%s147_s1] sm:$0xff]  ;;  %s102_s23 = smov 32   ;;  %vm29_vm0 = vcmask 261120   ;;  %s103_s24 = smov [#allocation5]  }
  0x13   :  { %26 = vrot.lane.b32.xlu0 %v24_v0, %s102_s23  ;;  %v31_v1 = vld [vmem:[#allocation2] sm:$0xff]  ;;  %s41_s25 = sshll.u32 %s103_s24, 4  ;;  %vm33_vm1 = vcmask 523264   ;;  %s42_s25 = int_to_ptr.vmem [resolvable:$true] %s41_s25 }
  0x14   :  { %s75_s26 = scalar_lea.vmem %s42_s25, 128  ;;  %p80_p9 = scmp.lt.s32.totalorder %s42_s25, %s42_s25 }
  0x15   :  { %p76_p8 = scmp.ne.s32.totalorder %s42_s25, %s75_s26  ;;  %p81_p10 = scmp.lt.s32.totalorder %s75_s26, %s75_s26 }
  0x17   :  { %p82_p11 = por %p81_p10, %p80_p9 }
  0x19   :  { %p83_p12 = pnand %p82_p11, %p76_p8 }
  0x85   :  { %v27_v2 = vpop.permute.xlu0 %26 }
  0x86   :  { %v30_v3 = vsel %vm29_vm0, %v24_v0, %v27_v2 }
  0x87   :  { %v32_v4 = vadd.f32 %v31_v1, %v30_v3 }
  0x89   :  { %34 = vst.msk [vmem:[#allocation5] sm:$0xff] %vm33_vm1, %v32_v4 }
  0x8a   :  { %86 = shalt.err (!%p83_p12)
}
  0x8b   :  { %s87_s27 = scalar_lea.hbm %s148_s2, 128 }
  0x8c   :  { %p88_p13 = scmp.ne.s32.totalorder %s148_s2, %s87_s27  ;;  %p91_p0 = scmp.lt.u32.totalorder %s87_s27, %s148_s2 }
  0x8e   :  { %p93_p1 = pnand %p91_p0, %p88_p13 }
  0x90   :  { %96 = shalt.err (!%p93_p1)
}
  0x91   :  { %44 = dma.vmem_to_hbm [thread:$0]  %s42_s25, 128, %s148_s2, [#allocation4]  }
  0x92   :  { %99 = dma.done.wait [#allocation4], 128  }
  0x93   :  { %100 = vsyncadd [#allocation4], 4294967168 }
  0x94   :  { %48 = vsyncpa [#allocation3], 1 }
  0x95   :  { %49 = vsyncpa [#allocation4], 1 }

</bundles_post_ra>
